<compile_context>
chip_gen: v5e
topology: v5e:2x2
jax: 0.10.0
libtpu: 0.0.40
codegen_flags: <defaults>
</compile_context>

<pallas_src>
import jax
import jax.numpy as jnp
from jax.experimental import pallas as pl
from jax.experimental.pallas import tpu as pltpu

MAX_LENGTH = 16     # module default is 50; small value for the synthetic example
HIDDEN = 32
OUTPUT = 64         # vocab size
PACK = 128          # one 128-lane group


def _build_kernel(H, V, L):
    P = PACK

    def kernel(emb_ref,    # (Tp, H)   gathered embedding rows (rows >= T are pad)
               enc_ref,    # (P, H)    encoder_outputs zero-padded to 128 rows
               sb_ref,     # (8, 4P)   rows: [b_gates | b_ac | b_out | h0 | c0 | pad]
               wk32_ref,   # (H, 8P)   K=H slab: [attn_top|comb_top|attn_bot|whh i,f,g,o|comb_bot]
               wk128_ref,  # (P, 5P)   K=128 slab: [wih i,f,g,o | w_out]
               out_ref):   # (Tp, 2P)  [logits group | attn_w group]
        f32 = jnp.float32
        Tp = emb_ref.shape[0]

        # ---- per-call (loop-invariant) pieces: hidden is NOT updated across steps ----
        h0 = sb_ref[3:4, 0:H]                                            # (1, H)
        h_all = jnp.dot(h0, wk32_ref[:, 2 * P:7 * P],
                        preferred_element_type=f32)                      # (1, 5P)
        h_attn = h_all[:, 0:P]                                           # hidden term of attn scores
        g_h = h_all[:, P:5 * P] + sb_ref[0:1, :]                         # hidden term + bias of gates
        # fold attn_applied @ Wc_bottom into a precomputed enc @ Wc_bottom
        enc_wcb = jnp.dot(enc_ref[...], wk32_ref[:, 7 * P:8 * P],
                          preferred_element_type=f32)                    # (P, P)

        # ---- all T decode steps batched into (Tp, .) tensor ops ----
        emb = emb_ref[...]                                               # (Tp, H)
        et = jnp.dot(emb, wk32_ref[:, 0:2 * P],
                     preferred_element_type=f32) + sb_ref[1:2, 0:2 * P]  # (Tp, 2P)

        # softmax over the L encoder positions, computed on a full aligned 128-lane group
        scores = et[:, 0:P] + h_attn                                     # lanes >= L are exactly 0
        lane = jax.lax.broadcasted_iota(jnp.int32, (Tp, P), 1)
        scores = jnp.where(lane < L, scores, -1e30)
        m = jnp.max(scores, axis=1, keepdims=True)
        e = jnp.exp(scores - m)
        attn_w = e * pl.reciprocal(jnp.sum(e, axis=1, keepdims=True), approx=True)  # (Tp, P)

        # atten_combine(cat(embedded, attn_applied)) -> relu ; lanes >= H stay exactly 0
        ab = jnp.dot(attn_w, enc_wcb, preferred_element_type=f32)        # (Tp, P)
        x = jnp.maximum(et[:, P:2 * P] + ab, 0.0)                        # (Tp, P)

        # single-step LSTM cell; each gate lives in its own 128-lane group (aligned slices)
        gates = jnp.dot(x, wk128_ref[:, 0:4 * P], preferred_element_type=f32) + g_h  # (Tp, 4P)
        i_g = jax.nn.sigmoid(gates[:, 0:P])
        f_g = jax.nn.sigmoid(gates[:, P:2 * P])
        g_g = jnp.tanh(gates[:, 2 * P:3 * P])
        o_g = jax.nn.sigmoid(gates[:, 3 * P:4 * P])
        c_new = f_g * sb_ref[4:5, 0:P] + i_g * g_g
        h_new = o_g * jnp.tanh(c_new)                                    # (Tp, P); lanes >= H are 0

        # self.out(lstm_output)
        logits = jnp.dot(h_new, wk128_ref[:, 4 * P:5 * P],
                         preferred_element_type=f32) + sb_ref[2:3, 0:P]  # (Tp, P)

        # two aligned full-lane-group stores: [logits | attn_w]
        out_ref[:, 0:P] = logits
        out_ref[:, P:2 * P] = attn_w

    return kernel


def init_params(key, hidden_size, output_size, max_length):
    H, V, L = hidden_size, output_size, max_length
    P = PACK
    assert L <= P and V <= P and H <= P, "demo packing assumes each group fits 128 lanes"

    ks = jax.random.split(key, 6)

    def linear(k, out_f, in_f):
        bound = 1.0 / (in_f ** 0.5)
        kw, kb = jax.random.split(k)
        w = jax.random.uniform(kw, (out_f, in_f), jnp.float32, -bound, bound)
        b = jax.random.uniform(kb, (out_f,), jnp.float32, -bound, bound)
        return w, b

    emb = jax.random.normal(ks[0], (V, H), jnp.float32)
    wa, ba = linear(ks[1], L, 2 * H)           # nn.Linear(2H, max_length)
    wc, bc = linear(ks[2], H, 2 * H)           # nn.Linear(2H, H)
    wih, bih = linear(ks[3], 4 * H, H)         # LSTM weight_ih_l0 / bias_ih_l0
    whh, bhh = linear(ks[4], 4 * H, H)         # LSTM weight_hh_l0 / bias_hh_l0
    wo, bo = linear(ks[5], V, H)               # nn.Linear(H, output_size)

    # K=H slab (RHS for emb rows / h0 / encoder rows).  128-lane groups:
    #   0 attn_top | 1 comb_top | 2 attn_bottom | 3..6 whh (i,f,g,o) | 7 comb_bottom
    wk32 = jnp.zeros((H, 8 * P), jnp.float32)
    wk32 = wk32.at[:, 0:L].set(wa[:, 0:H].T)
    wk32 = wk32.at[:, P:P + H].set(wc[:, 0:H].T)
    wk32 = wk32.at[:, 2 * P:2 * P + L].set(wa[:, H:2 * H].T)
    for k in range(4):
        wk32 = wk32.at[:, (3 + k) * P:(3 + k) * P + H].set(whh[k * H:(k + 1) * H, :].T)
    wk32 = wk32.at[:, 7 * P:7 * P + H].set(wc[:, H:2 * H].T)

    # K=128 slab (RHS for the zero-padded x / h_new rows).  Groups: 0..3 wih (i,f,g,o) | 4 w_out.
    wk128 = jnp.zeros((P, 5 * P), jnp.float32)
    for k in range(4):
        wk128 = wk128.at[0:H, k * P:k * P + H].set(wih[k * H:(k + 1) * H, :].T)
    wk128 = wk128.at[0:H, 4 * P:4 * P + V].set(wo.T)

    # state/bias slab: biases baked here; h0/c0 rows are filled per call by the wrapper
    sb = jnp.zeros((8, 4 * P), jnp.float32)
    for k in range(4):
        sb = sb.at[0, k * P:k * P + H].set(bih[k * H:(k + 1) * H] + bhh[k * H:(k + 1) * H])
    sb = sb.at[1, 0:L].set(ba)
    sb = sb.at[1, P:P + H].set(bc)
    sb = sb.at[2, 0:V].set(bo)

    params = dict(emb=emb, wk32=wk32, wk128=wk128, sb=sb)
    raw = dict(emb=emb, wa=wa, ba=ba, wc=wc, bc=bc,
               wih=wih, bih=bih, whh=whh, bhh=bhh, wo=wo, bo=bo)
    return params, raw


@jax.jit
def atten_decoder_decode(params, tokens, hidden, encoder_outputs):
    """Run T decoder steps in ONE grid-less pallas_call (weights resident in VMEM).

    Per the PyTorch module's semantics the returned hidden is the *input* hidden (the LSTM
    state is discarded), so every step uses the same (h, c) and all steps are independent
    and batched.  Returns (logits (T, V), attn_weights (T, L)).
    """
    emb = params["emb"]
    V, H = emb.shape
    L = encoder_outputs.shape[-2]
    T = int(tokens.shape[0])
    Tp = max(8, ((T + 7) // 8) * 8)          # full (8,128) sublane tiles -> unmasked stores

    h = hidden[0].reshape(H).astype(jnp.float32)
    c = hidden[1].reshape(H).astype(jnp.float32)
    sb = params["sb"].at[3, 0:H].set(h).at[4, 0:H].set(c)     # fold state into the bias slab

    enc = encoder_outputs.reshape(L, H).astype(jnp.float32)
    enc_pad = jnp.zeros((PACK, H), jnp.float32).at[0:L, :].set(enc)

    tok = jnp.zeros((Tp,), jnp.int32).at[0:T].set(tokens.astype(jnp.int32))
    emb_rows = jnp.take(emb, tok, axis=0)                     # gather only the needed rows

    vmem = pl.BlockSpec(memory_space=pltpu.MemorySpace.VMEM)
    out = pl.pallas_call(
        _build_kernel(H, V, L),
        out_shape=jax.ShapeDtypeStruct((Tp, 2 * PACK), jnp.float32),
        in_specs=[vmem] * 5,
        out_specs=vmem,
    )(emb_rows, enc_pad, sb, params["wk32"], params["wk128"])

    return out[0:T, 0:V], out[0:T, PACK:PACK + L]


def atten_decoder_forward(params, token, hidden, encoder_outputs):
    """Exact module forward: one decode step.
    Returns (output (1,1,V), hidden (unchanged), attn_weights (1,L))."""
    V = params["emb"].shape[0]
    logits, attn_w = atten_decoder_decode(params, token.reshape((1,)), hidden, encoder_outputs)
    # The PyTorch module returns the *input* hidden unchanged (LSTM state is discarded).
    return logits.reshape(1, 1, V), hidden, attn_w


def ref_forward(raw, token, hidden, encoder_outputs):
    """Pure-JAX reference using the original (PyTorch-layout) weights."""
    H = raw["emb"].shape[1]
    L = raw["wa"].shape[0]
    h = hidden[0].reshape(1, H)
    c = hidden[1].reshape(1, H)
    emb = raw["emb"][token].reshape(1, H)
    scores = jnp.concatenate([emb, h], axis=1) @ raw["wa"].T + raw["ba"][None, :]
    aw = jax.nn.softmax(scores, axis=1)
    applied = aw @ encoder_outputs.reshape(L, H)
    x = jnp.maximum(jnp.concatenate([emb, applied], axis=1) @ raw["wc"].T + raw["bc"][None, :], 0.0)
    gates = x @ raw["wih"].T + h @ raw["whh"].T + (raw["bih"] + raw["bhh"])[None, :]
    i = jax.nn.sigmoid(gates[:, 0:H])
    f = jax.nn.sigmoid(gates[:, H:2 * H])
    g = jnp.tanh(gates[:, 2 * H:3 * H])
    o = jax.nn.sigmoid(gates[:, 3 * H:4 * H])
    c_new = f * c + i * g
    h_new = o * jnp.tanh(c_new)
    logits = h_new @ raw["wo"].T + raw["bo"][None, :]
    return logits.reshape(1, 1, -1), aw


if __name__ == "__main__":
    key = jax.random.PRNGKey(0)
    kp, kh, kc, ke, kt = jax.random.split(key, 5)
    H, V, L = HIDDEN, OUTPUT, MAX_LENGTH

    params, raw = init_params(kp, H, V, L)
    h0 = jax.random.normal(kh, (1, 1, H), jnp.float32)
    c0 = jax.random.normal(kc, (1, 1, H), jnp.float32)
    encoder_outputs = jax.random.normal(ke, (1, L, H), jnp.float32)

    # --- single decoder step: matches the nn.Module.forward signature ---
    token = jnp.array([3], dtype=jnp.int32)
    out, hidden_out, attn_w = atten_decoder_forward(params, token, (h0, c0), encoder_outputs)
    jax.block_until_ready((out, attn_w))

    ref_out, ref_aw = ref_forward(raw, token, (h0, c0), encoder_outputs)
    assert out.shape == (1, 1, V) and attn_w.shape == (1, L)
    assert hidden_out[0].shape == (1, 1, H) and hidden_out[1].shape == (1, 1, H)
    assert jnp.allclose(out, ref_out, rtol=1e-2, atol=1e-2)
    assert jnp.allclose(attn_w, ref_aw, rtol=1e-2, atol=1e-2)

    # --- fused multi-step decode: T steps batched inside ONE pallas_call ---
    T = 8
    tokens = jax.random.randint(kt, (T,), 0, V, dtype=jnp.int32)
    logits_all, attn_all = atten_decoder_decode(params, tokens, (h0, c0), encoder_outputs)
    jax.block_until_ready((logits_all, attn_all))
    for t in range(T):
        r_out, r_aw = ref_forward(raw, tokens[t:t + 1], (h0, c0), encoder_outputs)
        assert jnp.allclose(logits_all[t:t + 1], r_out.reshape(1, V), rtol=1e-2, atol=1e-2)
        assert jnp.allclose(attn_all[t:t + 1], r_aw, rtol=1e-2, atol=1e-2)

    print("KERNEL_OK")
</pallas_src>

<mosaic_0001>
module attributes {stable_mosaic.version = 11 : i64} {
  func.func @kernel(%arg0: memref<8x32xf32, #tpu.memory_space<vmem>>, %arg1: memref<128x32xf32, #tpu.memory_space<vmem>>, %arg2: memref<8x512xf32, #tpu.memory_space<vmem>>, %arg3: memref<32x1024xf32, #tpu.memory_space<vmem>>, %arg4: memref<128x640xf32, #tpu.memory_space<vmem>>, %arg5: memref<8x256xf32, #tpu.memory_space<vmem>>) attributes {dimension_semantics = [], scalar_prefetch = 0 : i64, scratch_operands = 0 : i64, tpu.core_type = #tpu.core_type<tc>} {
    %c3 = arith.constant 3 : index
    %c0 = arith.constant 0 : index
    %0 = vector.load %arg2[%c3, %c0] : memref<8x512xf32, #tpu.memory_space<vmem>>, vector<1x32xf32>
    %c0_0 = arith.constant 0 : index
    %c256 = arith.constant 256 : index
    %1 = vector.load %arg3[%c0_0, %c256] : memref<32x1024xf32, #tpu.memory_space<vmem>>, vector<32x640xf32>
    %cst = arith.constant dense<0.000000e+00> : vector<1x640xf32>
    %2 = tpu.matmul %0, %1, %cst {dimension_numbers = #tpu.dot_dimension_numbers<[1], [0], [0], [1], [0, 0, 1, 1], [], []>} : vector<1x32xf32>, vector<32x640xf32>, vector<1x640xf32> -> vector<1x640xf32>
    %3 = vector.extract_strided_slice %2 {offsets = [0, 0], sizes = [1, 128], strides = [1, 1]} : vector<1x640xf32> to vector<1x128xf32>
    %4 = vector.extract_strided_slice %2 {offsets = [0, 128], sizes = [1, 512], strides = [1, 1]} : vector<1x640xf32> to vector<1x512xf32>
    %c0_1 = arith.constant 0 : index
    %c0_2 = arith.constant 0 : index
    %5 = vector.load %arg2[%c0_1, %c0_2] : memref<8x512xf32, #tpu.memory_space<vmem>>, vector<1x512xf32>
    %6 = arith.addf %4, %5 : vector<1x512xf32>
    %c0_3 = arith.constant 0 : index
    %c0_4 = arith.constant 0 : index
    %7 = vector.load %arg1[%c0_3, %c0_4] : memref<128x32xf32, #tpu.memory_space<vmem>>, vector<128x32xf32>
    %c0_5 = arith.constant 0 : index
    %c896 = arith.constant 896 : index
    %8 = vector.load %arg3[%c0_5, %c896] : memref<32x1024xf32, #tpu.memory_space<vmem>>, vector<32x128xf32>
    %cst_6 = arith.constant dense<0.000000e+00> : vector<128x128xf32>
    %9 = tpu.matmul %7, %8, %cst_6 {dimension_numbers = #tpu.dot_dimension_numbers<[1], [0], [0], [1], [0, 0, 1, 1], [], []>} : vector<128x32xf32>, vector<32x128xf32>, vector<128x128xf32> -> vector<128x128xf32>
    %c0_7 = arith.constant 0 : index
    %c0_8 = arith.constant 0 : index
    %10 = vector.load %arg0[%c0_7, %c0_8] : memref<8x32xf32, #tpu.memory_space<vmem>>, vector<8x32xf32>
    %c0_9 = arith.constant 0 : index
    %c0_10 = arith.constant 0 : index
    %11 = vector.load %arg3[%c0_9, %c0_10] : memref<32x1024xf32, #tpu.memory_space<vmem>>, vector<32x256xf32>
    %cst_11 = arith.constant dense<0.000000e+00> : vector<8x256xf32>
    %12 = tpu.matmul %10, %11, %cst_11 {dimension_numbers = #tpu.dot_dimension_numbers<[1], [0], [0], [1], [0, 0, 1, 1], [], []>} : vector<8x32xf32>, vector<32x256xf32>, vector<8x256xf32> -> vector<8x256xf32>
    %c1 = arith.constant 1 : index
    %c0_12 = arith.constant 0 : index
    %13 = vector.load %arg2[%c1, %c0_12] : memref<8x512xf32, #tpu.memory_space<vmem>>, vector<1x256xf32>
    %14 = vector.broadcast %13 : vector<1x256xf32> to vector<8x256xf32>
    %15 = arith.addf %12, %14 : vector<8x256xf32>
    %16 = vector.extract_strided_slice %15 {offsets = [0, 0], sizes = [8, 128], strides = [1, 1]} : vector<8x256xf32> to vector<8x128xf32>
    %17 = vector.broadcast %3 : vector<1x128xf32> to vector<8x128xf32>
    %18 = arith.addf %16, %17 : vector<8x128xf32>
    %19 = tpu.iota {dimensions = array<i32: 1>} : vector<8x128xi32>
    %c16_i32 = arith.constant 16 : i32
    %20 = vector.broadcast %c16_i32 : i32 to vector<8x128xi32>
    %21 = arith.cmpi slt, %19, %20 : vector<8x128xi32>
    %cst_13 = arith.constant -1.000000e+30 : f32
    %22 = vector.broadcast %cst_13 : f32 to vector<8x128xf32>
    %23 = arith.select %21, %18, %22 : vector<8x128xi1>, vector<8x128xf32>
    %cst_14 = arith.constant dense<0xFF800000> : vector<8xf32>
    %24 = vector.multi_reduction <maximumf>, %23, %cst_14 [1] : vector<8x128xf32> to vector<8xf32>
    %25 = vector.shape_cast %24 : vector<8xf32> to vector<8x1xf32>
    %26 = vector.broadcast %25 : vector<8x1xf32> to vector<8x128xf32>
    %27 = arith.subf %23, %26 : vector<8x128xf32>
    %28 = math.exp %27 : vector<8x128xf32>
    %cst_15 = arith.constant dense<0.000000e+00> : vector<8xf32>
    %29 = vector.multi_reduction <add>, %28, %cst_15 [1] : vector<8x128xf32> to vector<8xf32>
    %30 = vector.shape_cast %29 : vector<8xf32> to vector<8x1xf32>
    %31 = tpu.reciprocal %30 {approx = true} : vector<8x1xf32> -> vector<8x1xf32>
    %32 = vector.broadcast %31 : vector<8x1xf32> to vector<8x128xf32>
    %33 = arith.mulf %28, %32 : vector<8x128xf32>
    %cst_16 = arith.constant dense<0.000000e+00> : vector<8x128xf32>
    %34 = tpu.matmul %33, %9, %cst_16 {dimension_numbers = #tpu.dot_dimension_numbers<[1], [0], [0], [1], [0, 0, 1, 1], [], []>} : vector<8x128xf32>, vector<128x128xf32>, vector<8x128xf32> -> vector<8x128xf32>
    %35 = vector.extract_strided_slice %15 {offsets = [0, 128], sizes = [8, 128], strides = [1, 1]} : vector<8x256xf32> to vector<8x128xf32>
    %36 = arith.addf %35, %34 : vector<8x128xf32>
    %cst_17 = arith.constant 0.000000e+00 : f32
    %37 = vector.broadcast %cst_17 : f32 to vector<8x128xf32>
    %38 = arith.maximumf %36, %37 : vector<8x128xf32>
    %c0_18 = arith.constant 0 : index
    %c0_19 = arith.constant 0 : index
    %39 = vector.load %arg4[%c0_18, %c0_19] : memref<128x640xf32, #tpu.memory_space<vmem>>, vector<128x512xf32>
    %cst_20 = arith.constant dense<0.000000e+00> : vector<8x512xf32>
    %40 = tpu.matmul %38, %39, %cst_20 {dimension_numbers = #tpu.dot_dimension_numbers<[1], [0], [0], [1], [0, 0, 1, 1], [], []>} : vector<8x128xf32>, vector<128x512xf32>, vector<8x512xf32> -> vector<8x512xf32>
    %41 = vector.broadcast %6 : vector<1x512xf32> to vector<8x512xf32>
    %42 = arith.addf %40, %41 : vector<8x512xf32>
    %43 = vector.extract_strided_slice %42 {offsets = [0, 0], sizes = [8, 128], strides = [1, 1]} : vector<8x512xf32> to vector<8x128xf32>
    %44 = arith.negf %43 : vector<8x128xf32>
    %45 = math.exp %44 : vector<8x128xf32>
    %cst_21 = arith.constant 1.000000e+00 : f32
    %46 = vector.broadcast %cst_21 : f32 to vector<8x128xf32>
    %47 = arith.addf %46, %45 : vector<8x128xf32>
    %48 = arith.divf %46, %47 : vector<8x128xf32>
    %49 = vector.extract_strided_slice %42 {offsets = [0, 128], sizes = [8, 128], strides = [1, 1]} : vector<8x512xf32> to vector<8x128xf32>
    %50 = arith.negf %49 : vector<8x128xf32>
    %51 = math.exp %50 : vector<8x128xf32>
    %cst_22 = arith.constant 1.000000e+00 : f32
    %52 = vector.broadcast %cst_22 : f32 to vector<8x128xf32>
    %53 = arith.addf %52, %51 : vector<8x128xf32>
    %54 = arith.divf %52, %53 : vector<8x128xf32>
    %55 = vector.extract_strided_slice %42 {offsets = [0, 256], sizes = [8, 128], strides = [1, 1]} : vector<8x512xf32> to vector<8x128xf32>
    %56 = math.tanh %55 : vector<8x128xf32>
    %57 = vector.extract_strided_slice %42 {offsets = [0, 384], sizes = [8, 128], strides = [1, 1]} : vector<8x512xf32> to vector<8x128xf32>
    %58 = arith.negf %57 : vector<8x128xf32>
    %59 = math.exp %58 : vector<8x128xf32>
    %cst_23 = arith.constant 1.000000e+00 : f32
    %60 = vector.broadcast %cst_23 : f32 to vector<8x128xf32>
    %61 = arith.addf %60, %59 : vector<8x128xf32>
    %62 = arith.divf %60, %61 : vector<8x128xf32>
    %c4 = arith.constant 4 : index
    %c0_24 = arith.constant 0 : index
    %63 = vector.load %arg2[%c4, %c0_24] : memref<8x512xf32, #tpu.memory_space<vmem>>, vector<1x128xf32>
    %64 = vector.broadcast %63 : vector<1x128xf32> to vector<8x128xf32>
    %65 = arith.mulf %54, %64 : vector<8x128xf32>
    %66 = arith.mulf %48, %56 : vector<8x128xf32>
    %67 = arith.addf %65, %66 : vector<8x128xf32>
    %68 = math.tanh %67 : vector<8x128xf32>
    %69 = arith.mulf %62, %68 : vector<8x128xf32>
    %c0_25 = arith.constant 0 : index
    %c512 = arith.constant 512 : index
    %70 = vector.load %arg4[%c0_25, %c512] : memref<128x640xf32, #tpu.memory_space<vmem>>, vector<128x128xf32>
    %cst_26 = arith.constant dense<0.000000e+00> : vector<8x128xf32>
    %71 = tpu.matmul %69, %70, %cst_26 {dimension_numbers = #tpu.dot_dimension_numbers<[1], [0], [0], [1], [0, 0, 1, 1], [], []>} : vector<8x128xf32>, vector<128x128xf32>, vector<8x128xf32> -> vector<8x128xf32>
    %c2 = arith.constant 2 : index
    %c0_27 = arith.constant 0 : index
    %72 = vector.load %arg2[%c2, %c0_27] : memref<8x512xf32, #tpu.memory_space<vmem>>, vector<1x128xf32>
    %73 = vector.broadcast %72 : vector<1x128xf32> to vector<8x128xf32>
    %74 = arith.addf %71, %73 : vector<8x128xf32>
    %c0_28 = arith.constant 0 : index
    %c0_29 = arith.constant 0 : index
    %75 = vector.load %arg5[%c0_28, %c0_29] : memref<8x256xf32, #tpu.memory_space<vmem>>, vector<8x128xf32>
    tpu.vector_store %arg5[%c0_28, %c0_29], %74 {strides = array<i32>} : memref<8x256xf32, #tpu.memory_space<vmem>>, vector<8x128xf32>,
    %c0_30 = arith.constant 0 : index
    %c128 = arith.constant 128 : index
    %76 = vector.load %arg5[%c0_30, %c128] : memref<8x256xf32, #tpu.memory_space<vmem>>, vector<8x128xf32>
    tpu.vector_store %arg5[%c0_30, %c128], %33 {strides = array<i32>} : memref<8x256xf32, #tpu.memory_space<vmem>>, vector<8x128xf32>,
    return
  }
}

</mosaic_0001>

<bundles_post_ra>
// kernel: atten_decoder_decode.1
= control target key start
LH: loop header
LB: loop body
LE: loop exit
PB: predicated region body
PF: predicated region fallthrough
CT: control target
= control target key end

     0   :  { %10 = vsyncpa [#allocation3], 0  ;;  %s951_s0 = inlined_call_operand.vmem [shape: f32[8,32], index: 0, kind: input, shape index: {}]   ;;  %s952_s1 = inlined_call_operand.vmem [shape: f32[128,32], index: 1, kind: input, shape index: {}]   ;;  %s953_s2 = inlined_call_operand.vmem [shape: f32[8,512], index: 2, kind: input, shape index: {}]   ;;  %s954_s3 = inlined_call_operand.hbm [shape: f32[32,1024], index: 3, kind: input, shape index: {}]   ;;  %s955_s4 = inlined_call_operand.hbm [shape: f32[128,640], index: 4, kind: input, shape index: {}]   ;;  %s956_s5 = inlined_call_operand.vmem [shape: f32[8,256], index: 5, kind: output, shape index: {}]  }
   0x1   :  { %s22_s20 = sshll.u32 %s954_s3, 4  ;;  %s23_s20 = int_to_ptr.hbm [resolvable:$true] %s22_s20 }
   0x2   :  { %11 = vsyncpa [#allocation5], 0  ;;  %s786_s21 = smov [#allocation2]   ;;  %s35_s25 = sshll.u32 %s955_s4, 4  ;;  %s36_s25 = int_to_ptr.hbm [resolvable:$true] %s35_s25 }
   0x3   :  { %s24_s22 = sshll.u32 %s786_s21, 4  ;;  %s787_s26 = smov 1024   ;;  %s25_s22 = int_to_ptr.vmem [resolvable:$true] %s24_s22 }
   0x4   :  { %s788_s27 = smov 64   ;;  %s789_s28 = smov [#allocation4]  }
   0x5   :  { %30 = dma.hbm_to_vmem [thread:$0]  %s23_s20, 4096, %s25_s22, [#allocation3], %s787_s26, %s787_s26, %s788_s27  }
   0x6   :  { %s37_s29 = sshll.u32 %s789_s28, 4  ;;  %s790_s30 = smov 640   ;;  %s38_s29 = int_to_ptr.vmem [resolvable:$true] %s37_s29 }
   0x7   :  { %s791_s6 = smov 40  }
   0x8   :  { %43 = dma.hbm_to_vmem [thread:$0]  %s36_s25, 10240, %s38_s29, [#allocation5], %s790_s30, %s790_s30, %s791_s6  }
   0x9   :  { %782 = dma.done.wait [#allocation3], 4096  }
   0xa   :  { %783 = vsyncadd [#allocation3], 4294963200 }
   0xb   :  { %784 = dma.done.wait [#allocation5], 10240  }
   0xc   :  { %785 = vsyncadd [#allocation5], 4294957056  ;;  %v68_v0 = vld [vmem:[#allocation2 + $0xd0] sm:$0xff]  ;;  %v69_v4 = vld [vmem:[#allocation2 + $0xd8] sm:$0xff]  ;;  %vm73_vm0 = vcmask 261120   ;;  %v385_v39 = vlaneseq }
   0xd   :  { %v63_v1 = vld [vmem:[#allocation2 + $0x90] sm:$0xff]  ;;  %89 = vmatpush.msra.mxu2 %v68_v0  ;;  %v831_v5 = vld [vmem:[%s953_s2 + $0x3] ss:$0 sm:$0xff]  ;;  %109 = vmatpush.msra.mxu1 %v69_v4  ;;  %v64_v6 = vld [vmem:[#allocation2 + $0x98] sm:$0xff] }
   0xe   :  { %v58_v2 = vld [vmem:[#allocation2 + $0x50] sm:$0xff]  ;;  %v70_v7 = vld [vmem:[#allocation2 + $0xe0] sm:$0xff]  ;;  %v59_v8 = vld [vmem:[#allocation2 + $0x58] sm:$0xff]  ;;  %v386_v42 = vand.u32 127, %v385_v39 }
   0xf   :  { %90 = vmatpush.msra.mxu2 %v63_v1  ;;  %v53_v3 = vld [vmem:[#allocation2 + $0x10] sm:$0xff]  ;;  %110 = vmatpush.msra.mxu1 %v64_v6  ;;  %v210_v9 = vld [vmem:[#allocation2 + $0xf8] sm:$0xff]  ;;  %v65_v10 = vld [vmem:[#allocation2 + $0xa0] sm:$0xff] }
  0x10   :  { %v54_v11 = vld [vmem:[#allocation2 + $0x18] sm:$0xff]  ;;  %271 = vmatpush.msra.mxu0 %v210_v9  ;;  %v60_v13 = vld [vmem:[#allocation2 + $0x60] sm:$0xff]  ;;  %v197_v19 = vld [vmem:[%s952_s1 + $0x30] sm:$0xff]  ;;  %vm387_vm1 = vcmp.lt.s32.totalorder %v386_v42, 16 }
  0x11   :  { %91 = vmatpush.msra.mxu2 %v58_v2  ;;  %111 = vmatpush.msra.mxu1 %v59_v8  ;;  %v209_v12 = vld [vmem:[#allocation2 + $0xb8] sm:$0xff]  ;;  %v55_v15 = vld [vmem:[#allocation2 + $0x20] sm:$0xff]  ;;  %v200_v25 = vld [vmem:[%s952_s1 + $0x48] sm:$0xff] }
  0x12   :  { %272 = vmatpush.msra.mxu0 %v209_v12  ;;  %v208_v14 = vld [vmem:[#allocation2 + $0x78] sm:$0xff]  ;;  %v331_v17 = vld [vmem:[#allocation2 + $0xc0] sm:$0xff]  ;;  %v201_v26 = vld [vmem:[%s952_s1 + $0x50] sm:$0xff] }
  0x13   :  { %92 = vmatpush.msra.mxu2 %v53_v3  ;;  %112 = vmatpush.msra.mxu1 %v54_v11  ;;  %v207_v16 = vld [vmem:[#allocation2 + $0x38] sm:$0xff]  ;;  %v329_v18 = vld [vmem:[#allocation2 + $0x80] sm:$0xff]  ;;  %v204_v29 = vld [vmem:[%s952_s1 + $0x68] sm:$0xff] }
  0x14   :  { %677 = vmatmul.msk.f32.vlgmr.msra.gmra.mxu2 %vm73_vm0, %v831_v5  ;;  %678 = vmatmul.msk.f32.vlgmr.msra.gmra.mxu1 %vm73_vm0, %v831_v5  ;;  %v327_v20 = vld [vmem:[#allocation2 + $0x40] sm:$0xff]  ;;  %v198_v23 = vld [vmem:[%s952_s1 + $0x38] sm:$0xff]  ;;  %v205_v30 = vld [vmem:[%s952_s1 + $0x70] sm:$0xff] }
  0x15   :  { %129 = vmatpush.msrb.mxu2 %v70_v7  ;;  %273 = vmatpush.msra.mxu0 %v208_v14  ;;  %v325_v21 = vld [vmem:[#allocation2] sm:$0xff]  ;;  %v202_v27 = vld [vmem:[%s952_s1 + $0x58] sm:$0xff]  ;;  %v192_v33 = vld [vmem:[%s952_s1 + $0x8] sm:$0xff] }
  0x16   :  { %704 = vmatpush.msrb.mxu1 %v210_v9  ;;  %v846_v22 = vld [vmem:[%s951_s0] sm:$0xff]  ;;  %v206_v31 = vld [vmem:[%s952_s1 + $0x78] sm:$0xff]  ;;  %v193_v35 = vld [vmem:[%s952_s1 + $0x10] sm:$0xff] }
  0x17   :  { %130 = vmatpush.msrb.mxu2 %v65_v10  ;;  %274 = vmatpush.msra.mxu0 %v207_v16  ;;  %v199_v24 = vld [vmem:[%s952_s1 + $0x40] sm:$0xff]  ;;  %v194_v40 = vld [vmem:[%s952_s1 + $0x18] sm:$0xff]  ;;  %v196_v51 = vld [vmem:[%s952_s1 + $0x28] sm:$0xff] }
  0x18   :  { %705 = vmatpush.msrb.mxu1 %v209_v12  ;;  %v203_v28 = vld [vmem:[%s952_s1 + $0x60] sm:$0xff]  ;;  %v71_v63 = vld [vmem:[#allocation2 + $0xe8] sm:$0xff]  ;;  %v72_v8 = vld [vmem:[#allocation2 + $0xf0] sm:$0xff] }
  0x19   :  { %131 = vmatpush.msrb.mxu2 %v60_v13  ;;  %v191_v32 = vld [vmem:[%s952_s1] sm:$0xff]  ;;  %v66_v0 = vld [vmem:[#allocation2 + $0xa8] sm:$0xff]  ;;  %149 = vmatpush.msra.mxu3 %v71_v63  ;;  %v67_v9 = vld [vmem:[#allocation2 + $0xb0] sm:$0xff] }
  0x1a   :  { %706 = vmatpush.msrb.mxu1 %v208_v14  ;;  %682 = vmatmul.msk.f32.vlgmr.msra.gmra.mxu0 %vm73_vm0, %v191_v32  ;;  %v905_v38 = vld [vmem:[%s953_s2 + $0x1] ss:$8 sm:$0x3]  ;;  %v62_v10 = vld [vmem:[#allocation2 + $0x70] sm:$0xff]  ;;  %v461_v39 = vld [vmem:[#allocation4 + $0x198] sm:$0xff] }
  0x1b   :  { %132 = vmatpush.msrb.mxu2 %v55_v15  ;;  %v336_v41 = vperm.slane %v905_v38, 0  ;;  %v195_v48 = vld [vmem:[%s952_s1 + $0x20] sm:$0xff]  ;;  %v61_v3 = vld [vmem:[#allocation2 + $0x68] sm:$0xff]  ;;  %150 = vmatpush.msra.mxu3 %v66_v0  ;;  %v57_v12 = vld [vmem:[#allocation2 + $0x30] sm:$0xff] }
  0x1c   :  { %679 = vmatmul.msk.f32.vlgmr.msrb.gmra.mxu2 %vm73_vm0, %v831_v5  ;;  %707 = vmatpush.msrb.mxu1 %v207_v16  ;;  %v56_v6 = vld [vmem:[#allocation2 + $0x28] sm:$0xff]  ;;  %v457_v42 = vld [vmem:[#allocation4 + $0x170] sm:$0xff]  ;;  %v420_v63 = vld [vmem:[#allocation4] sm:$0xff] }
  0x1d   :  { %355 = vmatpush.msra.mxu2 %v331_v17  ;;  %688 = vmatmul.msk.f32.vlgmr.msrb.gmra.mxu1 %vm73_vm0, %v197_v19  ;;  %v332_v14 = vld [vmem:[#allocation2 + $0xc8] sm:$0xff]  ;;  %v480_v19 = vld [vmem:[#allocation4 + $0x258] sm:$0xff] }
  0x1e   :  { %151 = vmatpush.msra.mxu3 %v61_v3  ;;  %v330_v15 = vld [vmem:[#allocation2 + $0x88] sm:$0xff] }
  0x1f   :  { %356 = vmatpush.msra.mxu2 %v329_v18  ;;  %v328_v16 = vld [vmem:[#allocation2 + $0x48] sm:$0xff] }
  0x20   :  { %152 = vmatpush.msra.mxu3 %v56_v6  ;;  %v326_v17 = vld [vmem:[#allocation2 + $0x8] sm:$0xff]  ;;  %v471_v6 = vld [vmem:[#allocation4 + $0x1f8] sm:$0xff] }
  0x21   :  { %357 = vmatpush.msra.mxu2 %v327_v20  ;;  %680 = vmatmul.msk.f32.vlgmr.msra.gmra.mxu3 %vm73_vm0, %v831_v5  ;;  %v476_v20 = vld [vmem:[#allocation4 + $0x230] sm:$0xff]  ;;  %v456_v32 = vld [vmem:[#allocation4 + $0x168] sm:$0xff] }
  0x22   :  { %683 = vmatmul.msk.f32.gmra.mxu0 %vm73_vm0, %v192_v33  ;;  %169 = vmatpush.msrb.mxu3 %v72_v8  ;;  %v465_v33 = vld [vmem:[#allocation4 + $0x1c0] sm:$0xff]  ;;  %v479_v3 = vld [vmem:[#allocation4 + $0x248] sm:$0xff] }
  0x23   :  { %358 = vmatpush.msra.mxu2 %v325_v21  ;;  %v468_v21 = vld [vmem:[#allocation4 + $0x1e0] sm:$0xff]  ;;  %v463_v8 = vld [vmem:[#allocation4 + $0x1a8] sm:$0xff] }
  0x24   :  { %699 = vmatmul.msk.f32.vlgmr.msra.gmra.mxu2 %vm73_vm0, %v846_v22  ;;  %170 = vmatpush.msrb.mxu3 %v67_v9  ;;  %v459_v9 = vld [vmem:[#allocation4 + $0x180] sm:$0xff] }
  0x25   :  { %689 = vmatmul.msk.f32.gmra.mxu1 %vm73_vm0, %v198_v23  ;;  %488 = vmatpush.msrb.mxu2 %v480_v19  ;;  %v481_v23 = vld [vmem:[#allocation4 + $0x260] sm:$0xff]  ;;  %v422_v19 = vld [vmem:[#allocation4 + $0x10] sm:$0xff] }
  0x26   :  { %171 = vmatpush.msrb.mxu3 %v62_v10  ;;  %v455_v10 = vld [vmem:[#allocation4 + $0x158] sm:$0xff] }
  0x27   :  { %489 = vmatpush.msrb.mxu2 %v476_v20  ;;  %v439_v20 = vld [vmem:[#allocation4 + $0xb8] sm:$0xff] }
  0x28   :  { %172 = vmatpush.msrb.mxu3 %v57_v12  ;;  %v429_v12 = vld [vmem:[#allocation4 + $0x58] sm:$0xff] }
  0x29   :  { %681 = vmatmul.msk.f32.vlgmr.msrb.gmra.mxu3 %vm73_vm0, %v831_v5  ;;  %v472_v5 = vld [vmem:[#allocation4 + $0x208] sm:$0xff] }
  0x2a   :  { %684 = vmatmul.msk.f32.gmra.mxu0 %vm73_vm0, %v193_v35  ;;  %375 = vmatpush.msra.mxu3 %v332_v14  ;;  %v452_v35 = vld [vmem:[#allocation4 + $0x140] sm:$0xff]  ;;  %v447_v14 = vld [vmem:[#allocation4 + $0x108] sm:$0xff] }
  0x2b   :  { %490 = vmatpush.msrb.mxu2 %v472_v5 }
  0x2c   :  { %376 = vmatpush.msra.mxu3 %v330_v15  ;;  %v425_v15 = vld [vmem:[#allocation4 + $0x30] sm:$0xff] }
  0x2d   :  { %690 = vmatmul.msk.f32.gmra.mxu1 %vm73_vm0, %v199_v24  ;;  %v482_v24 = vld [vmem:[#allocation4 + $0x268] sm:$0xff]  ;;  %491 = vmatpush.msrb.mxu2 %v468_v21  ;;  %v435_v21 = vld [vmem:[#allocation4 + $0x90] sm:$0xff] }
  0x2e   :  { %377 = vmatpush.msra.mxu3 %v328_v16  ;;  %v426_v16 = vld [vmem:[#allocation4 + $0x38] sm:$0xff] }
  0x30   :  { %378 = vmatpush.msra.mxu3 %v326_v17  ;;  %v443_v17 = vld [vmem:[#allocation4 + $0xe0] sm:$0xff] }
  0x31   :  { %700 = vmatmul.msk.f32.vlgmr.msra.gmra.mxu3 %vm73_vm0, %v846_v22  ;;  %v474_v22 = vld [vmem:[#allocation4 + $0x218] sm:$0xff] }
  0x32   :  { %685 = vmatmul.msk.f32.gmra.mxu0 %vm73_vm0, %v194_v40  ;;  %508 = vmatpush.msrb.mxu3 %v481_v23  ;;  %v462_v40 = vld [vmem:[#allocation4 + $0x1a0] sm:$0xff]  ;;  %v431_v23 = vld [vmem:[#allocation4 + $0x68] sm:$0xff] }
  0x35   :  { %691 = vmatmul.msk.f32.gmra.mxu1 %vm73_vm0, %v200_v25  ;;  %v477_v25 = vld [vmem:[#allocation4 + $0x238] sm:$0xff] }
  0x36   :  { %509 = vmatpush.msrb.mxu3 %v477_v25  ;;  %v423_v25 = vld [vmem:[#allocation4 + $0x18] sm:$0xff] }
  0x3a   :  { %686 = vmatmul.msk.f32.gmra.mxu0 %vm73_vm0, %v195_v48  ;;  %v449_v48 = vld [vmem:[#allocation4 + $0x120] sm:$0xff] }
  0x3d   :  { %692 = vmatmul.msk.f32.gmra.mxu1 %vm73_vm0, %v201_v26  ;;  %v478_v26 = vld [vmem:[#allocation4 + $0x240] sm:$0xff] }
  0x42   :  { %687 = vmatmul.msk.f32.gmra.mxu0 %vm73_vm0, %v196_v51  ;;  %v445_v51 = vld [vmem:[#allocation4 + $0xf8] sm:$0xff] }
  0x45   :  { %693 = vmatmul.msk.f32.gmra.mxu1 %vm73_vm0, %v202_v27  ;;  %v464_v27 = vld [vmem:[#allocation4 + $0x1b8] sm:$0xff] }
  0x46   :  { %492 = vmatpush.msrb.mxu2 %v464_v27  ;;  %v337_v27 = vperm.slane %v905_v38, 1  ;;  %v177_v38 = vld [vmem:[%s953_s2] ss:$8 sm:$0xf] }
  0x4d   :  { %694 = vmatmul.msk.f32.gmra.mxu1 %vm73_vm0, %v203_v28  ;;  %v473_v28 = vld [vmem:[#allocation4 + $0x210] sm:$0xff] }
  0x4e   :  { %510 = vmatpush.msrb.mxu3 %v473_v28 }
  0x55   :  { %695 = vmatmul.msk.f32.gmra.mxu1 %vm73_vm0, %v204_v29  ;;  %v460_v29 = vld [vmem:[#allocation4 + $0x190] sm:$0xff] }
  0x56   :  { %493 = vmatpush.msrb.mxu2 %v460_v29 }
  0x58   :  { %494 = vmatpush.msrb.mxu2 %v456_v32  ;;  %v647_v32 = vld [vmem:[#allocation4 + $0x278] sm:$0xff] }
  0x5a   :  { %495 = vmatpush.msrb.mxu2 %v452_v35  ;;  %v644_v35 = vld [vmem:[#allocation4 + $0x200] sm:$0xff] }
  0x5d   :  { %696 = vmatmul.msk.f32.gmra.mxu1 %vm73_vm0, %v205_v30  ;;  %v469_v30 = vld [vmem:[#allocation4 + $0x1e8] sm:$0xff] }
  0x5e   :  { %511 = vmatpush.msrb.mxu3 %v469_v30 }
  0x60   :  { %512 = vmatpush.msrb.mxu3 %v465_v33  ;;  %v646_v33 = vld [vmem:[#allocation4 + $0x250] sm:$0xff] }
  0x62   :  { %513 = vmatpush.msrb.mxu3 %v461_v39  ;;  %v643_v39 = vld [vmem:[#allocation4 + $0x1d8] sm:$0xff] }
  0x64   :  { %514 = vmatpush.msrb.mxu3 %v457_v42  ;;  %v642_v42 = vld [vmem:[#allocation4 + $0x1b0] sm:$0xff] }
  0x65   :  { %697 = vmatmul.msk.f32.gmra.mxu1 %vm73_vm0, %v206_v31  ;;  %v470_v31 = vld [vmem:[#allocation4 + $0x1f0] sm:$0xff] }
  0x91   :  { %v897_v36 = vpop.f32.mrf.mxu1 }
  0x97   :  { %v94_v34 = vpop.f32.mrf.mxu2  ;;  %v276_v60 = vpop.f32.mrf.mxu0 }
  0x98   :  { %v383_v45 = vperm.slane %v94_v34, 0  ;;  %v466_v34 = vld [vmem:[#allocation4 + $0x1c8] sm:$0xff] }
  0x9a   :  { %v294_v43 = vpop.f32.mrf.mxu1 }
  0x9f   :  { %v900_v37 = vpop.f32.mrf.mxu2  ;;  %v279_v61 = vpop.f32.mrf.mxu0 }
  0xa2   :  { %v297_v50 = vpop.f32.mrf.mxu1 }
  0xa4   :  { %v933_v5 = vpop.f32.mrf.mxu3 }
  0xa7   :  { %v360_v44 = vpop.f32.mrf.mxu2  ;;  %v282_v62 = vpop.f32.mrf.mxu0 }
  0xa8   :  { %v361_v46 = vadd.f32 %v360_v44, %v336_v41  ;;  %v448_v41 = vld [vmem:[#allocation4 + $0x118] sm:$0xff]  ;;  %v444_v44 = vld [vmem:[#allocation4 + $0xf0] sm:$0xff] }
  0xa9   :  { %496 = vmatpush.msrb.mxu2 %v448_v41  ;;  %v179_v41 = vperm.slane %v177_v38, 0 }
  0xaa   :  { %v384_v47 = vadd.f32 %v383_v45, %v361_v46  ;;  %v300_v52 = vpop.f32.mrf.mxu1  ;;  %v453_v45 = vld [vmem:[#allocation4 + $0x148] sm:$0xff]  ;;  %v454_v46 = vld [vmem:[#allocation4 + $0x150] sm:$0xff] }
  0xab   :  { %497 = vmatpush.msrb.mxu2 %v444_v44  ;;  %515 = vmatpush.msrb.mxu3 %v453_v45  ;;  %v187_v45 = vadd.f32 %v179_v41, %v897_v36  ;;  %v635_v36 = vld [vmem:[#allocation4 + $0x98] sm:$0xff] }
  0xac   :  { %v388_v49 = vsel %vm387_vm1, %v384_v47, -1e+30  ;;  %v440_v47 = vld [vmem:[#allocation4 + $0xc8] sm:$0xff] }
  0xad   :  { %389 = vmax.xlane.f32.xlu0 %v388_v49  ;;  %498 = vmatpush.msrb.mxu2 %v440_v47  ;;  %v639_v47 = vld [vmem:[#allocation4 + $0x138] sm:$0xff] }
  0xae   :  { %516 = vmatpush.msrb.mxu3 %v449_v48 }
  0xaf   :  { %v285_v7 = vpop.f32.mrf.mxu0 }
  0xb0   :  { %517 = vmatpush.msrb.mxu3 %v445_v51  ;;  %v638_v51 = vld [vmem:[#allocation4 + $0x110] sm:$0xff] }
  0xb2   :  { %v303_v53 = vpop.f32.mrf.mxu1 }
  0xb7   :  { %v288_v13 = vpop.f32.mrf.mxu0 }
  0xba   :  { %v306_v54 = vpop.f32.mrf.mxu1 }
  0xbf   :  { %v291_v18 = vpop.f32.mrf.mxu0 }
  0xc2   :  { %v309_v55 = vpop.f32.mrf.mxu1 }
  0xca   :  { %v312_v56 = vpop.f32.mrf.mxu1 }
  0xd2   :  { %v315_v57 = vpop.f32.mrf.mxu1 }
  0xda   :  { %v318_v58 = vpop.f32.mrf.mxu1 }
  0xe2   :  { %v321_v59 = vpop.f32.mrf.mxu1 }
  0xe3   :  { %398 = vmatpush.msrb.mxu0 %v321_v59  ;;  %v438_v59 = vld [vmem:[#allocation4 + $0xb0] sm:$0xff] }
  0xe5   :  { %399 = vmatpush.msrb.mxu0 %v318_v58  ;;  %v437_v58 = vld [vmem:[#allocation4 + $0xa8] sm:$0xff] }
  0xe7   :  { %400 = vmatpush.msrb.mxu0 %v315_v57  ;;  %v428_v57 = vld [vmem:[#allocation4 + $0x50] sm:$0xff] }
  0xe9   :  { %401 = vmatpush.msrb.mxu0 %v312_v56  ;;  %v442_v56 = vld [vmem:[#allocation4 + $0xd8] sm:$0xff] }
  0xeb   :  { %402 = vmatpush.msrb.mxu0 %v309_v55  ;;  %v441_v55 = vld [vmem:[#allocation4 + $0xd0] sm:$0xff] }
  0xec   :  { %518 = vmatpush.msrb.mxu3 %v441_v55 }
  0xed   :  { %403 = vmatpush.msrb.mxu0 %v306_v54  ;;  %v432_v54 = vld [vmem:[#allocation4 + $0x78] sm:$0xff] }
  0xee   :  { %519 = vmatpush.msrb.mxu3 %v437_v58 }
  0xef   :  { %404 = vmatpush.msrb.mxu0 %v303_v53 }
  0xf1   :  { %405 = vmatpush.msrb.mxu0 %v300_v52  ;;  %v446_v52 = vld [vmem:[#allocation4 + $0x100] sm:$0xff] }
  0xf3   :  { %406 = vmatpush.msrb.mxu0 %v297_v50  ;;  %v436_v50 = vld [vmem:[#allocation4 + $0xa0] sm:$0xff] }
  0xf4   :  { %499 = vmatpush.msrb.mxu2 %v436_v50  ;;  %v182_v50 = vperm.slane %v177_v38, 3 }
  0xf5   :  { %407 = vmatpush.msrb.mxu0 %v294_v43  ;;  %v458_v43 = vld [vmem:[#allocation4 + $0x178] sm:$0xff] }
  0xf6   :  { %500 = vmatpush.msrb.mxu2 %v432_v54 }
  0xf7   :  { %408 = vmatpush.msrb.mxu0 %v291_v18  ;;  %v421_v18 = vld [vmem:[#allocation4 + $0x8] sm:$0xff] }
  0xf8   :  { %501 = vmatpush.msrb.mxu2 %v428_v57  ;;  %v636_v57 = vld [vmem:[#allocation4 + $0xc0] sm:$0xff] }
  0xf9   :  { %409 = vmatpush.msrb.mxu0 %v288_v13  ;;  %v430_v13 = vld [vmem:[#allocation4 + $0x60] sm:$0xff] }
  0xfb   :  { %410 = vmatpush.msrb.mxu0 %v285_v7  ;;  %v467_v7 = vld [vmem:[#allocation4 + $0x1d0] sm:$0xff] }
  0xfd   :  { %411 = vmatpush.msrb.mxu0 %v282_v62  ;;  %v434_v62 = vld [vmem:[#allocation4 + $0x88] sm:$0xff] }
  0xff   :  { %412 = vmatpush.msrb.mxu0 %v279_v61  ;;  %v433_v61 = vld [vmem:[#allocation4 + $0x80] sm:$0xff] }
 0x100   :  { %520 = vmatpush.msrb.mxu3 %v433_v61 }
 0x101   :  { %413 = vmatpush.msrb.mxu0 %v276_v60  ;;  %v424_v60 = vld [vmem:[#allocation4 + $0x28] sm:$0xff] }
 0x102   :  { %502 = vmatpush.msrb.mxu2 %v424_v60  ;;  %521 = vmatpush.msrb.mxu3 %v429_v12  ;;  %v634_v60 = vld [vmem:[#allocation4 + $0x70] sm:$0xff] }
 0x103   :  { %528 = vmatpush.msra.mxu0 %v482_v24  ;;  %v427_v24 = vld [vmem:[#allocation4 + $0x40] sm:$0xff] }
 0x104   :  { %503 = vmatpush.msrb.mxu2 %v420_v63  ;;  %522 = vmatpush.msrb.mxu3 %v425_v15 }
 0x105   :  { %529 = vmatpush.msra.mxu0 %v478_v26  ;;  %v174_v26 = vpop.f32.mrf.mxu3 }
 0x106   :  { %523 = vmatpush.msrb.mxu3 %v421_v18  ;;  %v190_v58 = vadd.f32 %v182_v50, %v174_v26 }
 0x107   :  { %530 = vmatpush.msra.mxu0 %v474_v22 }
 0x108   :  { %649 = vmatpush.msra.mxu3 %v647_v32  ;;  %v487_v61 = vperm.slane %v190_v58, 0 }
 0x109   :  { %531 = vmatpush.msra.mxu0 %v470_v31 }
 0x10a   :  { %650 = vmatpush.msra.mxu3 %v646_v33  ;;  %v626_v33 = vld [vmem:[%s953_s2 + $0x4] ss:$0 sm:$0xff] }
 0x10b   :  { %532 = vmatpush.msra.mxu0 %v466_v34  ;;  %v645_v34 = vld [vmem:[#allocation4 + $0x228] sm:$0xff] }
 0x10c   :  { %651 = vmatpush.msra.mxu3 %v645_v34 }
 0x10d   :  { %533 = vmatpush.msra.mxu0 %v462_v40  ;;  %v380_v28 = vpop.f32.mrf.mxu3  ;;  %v180_v40 = vperm.slane %v177_v38, 1 }
 0x10e   :  { %v381_v22 = vadd.f32 %v380_v28, %v337_v27  ;;  %652 = vmatpush.msra.mxu3 %v644_v35 }
 0x10f   :  { %534 = vmatpush.msra.mxu0 %v458_v43  ;;  %v641_v43 = vld [vmem:[#allocation4 + $0x188] sm:$0xff]  ;;  %v188_v44 = vadd.f32 %v180_v40, %v900_v37 }
 0x110   :  { %653 = vmatpush.msra.mxu3 %v643_v39 }
 0x111   :  { %535 = vmatpush.msra.mxu0 %v454_v46  ;;  %v640_v46 = vld [vmem:[#allocation4 + $0x160] sm:$0xff]  ;;  %v485_v48 = vperm.slane %v188_v44, 0 }
 0x112   :  { %654 = vmatpush.msra.mxu3 %v642_v42 }
 0x114   :  { %655 = vmatpush.msra.mxu3 %v641_v43 }
 0x116   :  { %656 = vmatpush.msra.mxu3 %v640_v46 }
 0x118   :  { %657 = vmatpush.msra.mxu3 %v639_v47 }
 0x11a   :  { %658 = vmatpush.msra.mxu3 %v638_v51 }
 0x120   :  { %v390_v1 = vpop.xlane.xlu0 %389 }
 0x121   :  { %v391_v2 = vsub.f32 %v388_v49, %v390_v1  ;;  %v450_v49 = vld [vmem:[#allocation4 + $0x128] sm:$0xff]  ;;  %v483_v1 = vld [vmem:[#allocation4 + $0x270] sm:$0xff] }
 0x122   :  { %536 = vmatpush.msra.mxu0 %v450_v49  ;;  %548 = vmatpush.msra.mxu2 %v483_v1  ;;  %v484_v49 = vperm.slane %v187_v45, 0  ;;  %v632_v1 = vld [vmem:[#allocation4 + $0x20] sm:$0xff] }
 0x123   :  { %v392_v4 = vmul.f32 1.442695, %v391_v2 }
 0x124   :  { %537 = vmatpush.msra.mxu0 %v446_v52  ;;  %549 = vmatpush.msra.mxu2 %v479_v3  ;;  %v637_v52 = vld [vmem:[#allocation4 + $0xe8] sm:$0xff] }
 0x125   :  { %714 = vpow2.f32 %v392_v4  ;;  %v475_v4 = vld [vmem:[#allocation4 + $0x220] sm:$0xff]  ;;  %659 = vmatpush.msra.mxu3 %v637_v52 }
 0x126   :  { %538 = vmatpush.msra.mxu0 %v442_v56  ;;  %550 = vmatpush.msra.mxu2 %v475_v4 }
 0x127   :  { %660 = vmatpush.msra.mxu3 %v636_v57 }
 0x128   :  { %539 = vmatpush.msra.mxu0 %v438_v59  ;;  %551 = vmatpush.msra.mxu2 %v471_v6 }
 0x129   :  { %661 = vmatpush.msra.mxu3 %v635_v36 }
 0x12a   :  { %540 = vmatpush.msra.mxu0 %v434_v62  ;;  %552 = vmatpush.msra.mxu2 %v467_v7  ;;  %v633_v62 = vld [vmem:[#allocation4 + $0x48] sm:$0xff] }
 0x12b   :  { %v922_v11 = vpop.eup %714  ;;  %662 = vmatpush.msra.mxu3 %v634_v60 }
 0x12c   :  { %394 = vadd.xlane.f32.xlu0 %v922_v11  ;;  %553 = vmatpush.msra.mxu2 %v463_v8 }
 0x12d   :  { %541 = vmatpush.msra.mxu0 %v430_v13  ;;  %663 = vmatpush.msra.mxu3 %v633_v62 }
 0x12e   :  { %554 = vmatpush.msra.mxu2 %v459_v9 }
 0x12f   :  { %542 = vmatpush.msra.mxu0 %v426_v16  ;;  %664 = vmatpush.msra.mxu3 %v632_v1 }
 0x130   :  { %555 = vmatpush.msra.mxu2 %v455_v10 }
 0x131   :  { %543 = vmatpush.msra.mxu0 %v422_v19 }
 0x19f   :  { %v395_v53 = vpop.xlane.xlu0 %394 }
 0x1a0   :  { %716 = vrcp.f32 %v395_v53 }
 0x1a6   :  { %v717_v0 = vpop.eup %716 }
 0x1a7   :  { %v397_v2 = vmul.f32 %v717_v0, %v922_v11  ;;  %v451_v11 = vld [vmem:[#allocation4 + $0x130] sm:$0xff] }
 0x1a8   :  { %556 = vmatpush.msra.mxu2 %v451_v11 }
 0x1a9   :  { %414 = vmatmul.f32.vlgmr.msrb.gmra.mxu0 %v397_v2  ;;  %670 = vst [vmem:[%s956_s5 + $0x8] sm:$0xff] %v397_v2  ;;  %v181_v2 = vperm.slane %v177_v38, 2 }
 0x1aa   :  { %557 = vmatpush.msra.mxu2 %v447_v14 }
 0x1ab   :  { %v189_v9 = vadd.f32 %v181_v2, %v933_v5 }
 0x1ac   :  { %558 = vmatpush.msra.mxu2 %v443_v17 }
 0x1ad   :  { %v486_v11 = vperm.slane %v189_v9, 0 }
 0x1ae   :  { %559 = vmatpush.msra.mxu2 %v439_v20 }
 0x1b0   :  { %560 = vmatpush.msra.mxu2 %v435_v21 }
 0x1b2   :  { %561 = vmatpush.msra.mxu2 %v431_v23 }
 0x1b4   :  { %562 = vmatpush.msra.mxu2 %v427_v24 }
 0x1b6   :  { %563 = vmatpush.msra.mxu2 %v423_v25 }
 0x226   :  { %v415_v29 = vpop.f32.mrf.mxu0 }
 0x227   :  { %v418_v30 = vadd.f32 %v415_v29, %v381_v22 }
 0x229   :  { %v419_v31 = vmax.f32 %v418_v30, 0.0 }
 0x22b   :  { %504 = vmatmul.f32.vlgmr.msrb.gmra.mxu2 %v419_v31  ;;  %524 = vmatmul.f32.vlgmr.msrb.gmra.mxu3 %v419_v31 }
 0x22c   :  { %544 = vmatmul.f32.vlgmr.msra.gmra.mxu0 %v419_v31 }
 0x233   :  { %564 = vmatmul.f32.vlgmr.msra.gmra.mxu2 %v419_v31 }
 0x2a9   :  { %v545_v10 = vpop.f32.mrf.mxu0 }
 0x2aa   :  { %v546_v14 = vadd.f32 %v545_v10, %v486_v11 }
 0x2ae   :  { %v505_v53 = vpop.f32.mrf.mxu2  ;;  %v525_v54 = vpop.f32.mrf.mxu3 }
 0x2af   :  { %v506_v55 = vadd.f32 %v505_v53, %v484_v49  ;;  %v526_v56 = vadd.f32 %v525_v54, %v485_v48  ;;  %v648_v53 = vld [vmem:[%s953_s2 + $0x2] ss:$0 sm:$0xff] }
 0x2b1   :  { %v701_v37 = vmul.f32 -1.442695, %v506_v55  ;;  %v702_v59 = vmul.f32 -1.442695, %v526_v56 }
 0x2b3   :  { %718 = vpow2.f32 %v701_v37 }
 0x2b4   :  { %720 = vpow2.f32 %v702_v59 }
 0x2b6   :  { %v565_v63 = vpop.f32.mrf.mxu2 }
 0x2b7   :  { %v566_v0 = vadd.f32 %v565_v63, %v487_v61 }
 0x2b9   :  { %v719_v3 = vpop.eup %718  ;;  %v703_v4 = vmul.f32 -1.442695, %v566_v0 }
 0x2ba   :  { %v721_v6 = vpop.eup %720  ;;  %v571_v7 = vadd.f32 1.0, %v719_v3 }
 0x2bb   :  { %v590_v8 = vadd.f32 1.0, %v721_v6  ;;  %722 = vpow2.f32 %v703_v4 }
 0x2bc   :  { %724 = vrcp.f32 %v571_v7  ;;  %v583_v20 = vand.u32 2147483648, %v571_v7  ;;  %v581_v24 = vand.u32 2147483647, %v571_v7  ;;  %vm577_vm4 = vweird.f32 %v571_v7 }
 0x2bd   :  { %726 = vrcp.f32 %v590_v8  ;;  %v602_v5 = vand.u32 2147483648, %v590_v8  ;;  %v600_v26 = vand.u32 2147483647, %v590_v8  ;;  %vm596_vm6 = vweird.f32 %v590_v8 }
 0x2be   :  { %v584_v22 = vor.u32 1.1754944e-38, %v583_v20  ;;  %vm582_vm7 = vcmp.eq.f32.partialorder %v581_v24, 8.507059e+37 }
 0x2bf   :  { %v603_v31 = vor.u32 1.1754944e-38, %v602_v5  ;;  %vm601_vm9 = vcmp.eq.f32.partialorder %v600_v26, 8.507059e+37 }
 0x2c1   :  { %v723_v12 = vpop.eup %722 }
 0x2c2   :  { %v725_v13 = vpop.eup %724  ;;  %v610_v15 = vadd.f32 1.0, %v723_v12 }
 0x2c3   :  { %v727_v16 = vpop.eup %726  ;;  %v573_v17 = vmul.f32 %v725_v13, %v571_v7  ;;  %vm578_vm2 = vweird.f32 %v725_v13 }
 0x2c4   :  { %v592_v18 = vmul.f32 %v727_v16, %v590_v8  ;;  %728 = vrcp.f32 %v610_v15  ;;  %vm597_vm3 = vweird.f32 %v727_v16  ;;  %vm579_vm5 = vmor %vm577_vm4, %vm578_vm2  ;;  %v622_v46 = vand.u32 2147483648, %v610_v15 }
 0x2c5   :  { %v574_v19 = vsub.f32 1.0, %v573_v17  ;;  %730 = vtanh.f32 %v546_v14  ;;  %vm598_vm8 = vmor %vm596_vm6, %vm597_vm3  ;;  %vm616_vm11 = vweird.f32 %v610_v15  ;;  %v620_v47 = vand.u32 2147483647, %v610_v15 }
 0x2c6   :  { %v593_v21 = vsub.f32 1.0, %v592_v18  ;;  %v623_v49 = vor.u32 1.1754944e-38, %v622_v46 }
 0x2c7   :  { %v575_v23 = vmul.f32 %v725_v13, %v574_v19  ;;  %vm621_vm13 = vcmp.eq.f32.partialorder %v620_v47, 8.507059e+37 }
 0x2c8   :  { %v594_v25 = vmul.f32 %v727_v16, %v593_v21 }
 0x2c9   :  { %v576_v27 = vadd.f32 %v725_v13, %v575_v23 }
 0x2ca   :  { %v729_v28 = vpop.eup %728  ;;  %v595_v29 = vadd.f32 %v727_v16, %v594_v25 }
 0x2cb   :  { %v580_v30 = vsel %vm579_vm5, %v725_v13, %v576_v27  ;;  %v612_v32 = vmul.f32 %v729_v28, %v610_v15  ;;  %v731_v34 = vpop.eup %730  ;;  %vm617_vm10 = vweird.f32 %v729_v28 }
 0x2cc   :  { %v599_v35 = vsel %vm598_vm8, %v727_v16, %v595_v29  ;;  %v585_v38 = vsel %vm582_vm7, %v584_v22, %v580_v30  ;;  %vm618_vm12 = vmor %vm616_vm11, %vm617_vm10 }
 0x2cd   :  { %v613_v39 = vsub.f32 1.0, %v612_v32  ;;  %v604_v40 = vsel %vm601_vm9, %v603_v31, %v599_v35  ;;  %v628_v41 = vmul.f32 %v731_v34, %v585_v38 }
 0x2ce   :  { %v627_v42 = vmul.f32 %v626_v33, %v604_v40 }
 0x2cf   :  { %v614_v43 = vmul.f32 %v729_v28, %v613_v39 }
 0x2d0   :  { %v629_v44 = vadd.f32 %v628_v41, %v627_v42 }
 0x2d1   :  { %v615_v45 = vadd.f32 %v729_v28, %v614_v43 }
 0x2d2   :  { %732 = vtanh.f32 %v629_v44 }
 0x2d3   :  { %v619_v48 = vsel %vm618_vm12, %v729_v28, %v615_v45 }
 0x2d4   :  { %v624_v51 = vsel %vm621_vm13, %v623_v49, %v619_v48 }
 0x2d8   :  { %v733_v50 = vpop.eup %732 }
 0x2d9   :  { %v631_v52 = vmul.f32 %v733_v50, %v624_v51 }
 0x2db   :  { %665 = vmatmul.f32.vlgmr.msra.gmra.mxu3 %v631_v52 }
 0x35e   :  { %v666_v54 = vpop.f32.mrf.mxu3 }
 0x35f   :  { %v667_v55 = vadd.f32 %v666_v54, %v648_v53 }
 0x361   :  { %669 = vst [vmem:[%s956_s5] sm:$0xff] %v667_v55 }
 0x362   :  { %675 = vsyncpa [#allocation3], 1 }
 0x363   :  { %676 = vsyncpa [#allocation5], 1 }

</bundles_post_ra>
